<compile_context>
chip_gen: v7x
topology: tpu7x:2x2x1
jax: 0.10.0
libtpu: 0.0.40
codegen_flags: <defaults>
</compile_context>

<pallas_src>
import math

import jax
import jax.numpy as jnp
from jax.experimental import pallas as pl
from jax.experimental.pallas import tpu as pltpu


def _sq_diff_partial_kernel(pred_ref, tgt_ref, out_ref):
    # pred_ref / tgt_ref: (tile_g, 8, n_cols) VMEM tiles in the native dtype.
    # out_ref:            (8, n_cols) f32 partial sum for this grid step.
    p = pred_ref[...].astype(jnp.float32)
    t = tgt_ref[...].astype(jnp.float32)
    d = p - t
    # Reduce over the leading (non-tiled) axis only: pure element-wise vreg
    # adds on the VPU.  The one cross-lane reduce happens once in the wrapper.
    out_ref[...] = jnp.sum(d * d, axis=0)


def _round_up(x, m):
    return ((x + m - 1) // m) * m


def _pick_tile_rows(n_rows, n_cols, itemsize, target_block_bytes):
    """Largest multiple-of-8 row tile that exactly divides n_rows (no padding
    pass needed) while keeping one input block <= target_block_bytes.
    Returns 0 if no acceptable exact divisor exists (caller pads instead)."""
    if n_rows % 8 != 0:
        return 0
    cap = max(8, (target_block_bytes // (n_cols * itemsize)) // 8 * 8)
    cap = min(cap, n_rows)
    best = 0
    for cand in range(8, cap + 1, 8):
        if n_rows % cand == 0:
            best = cand
    # Reject pathologically small exact divisors (they would leave the DMA
    # pipe idle); zero-padding with a bigger tile is cheaper in that case.
    if best == 0 or best * n_cols * itemsize * 8 < min(
        target_block_bytes, n_rows * n_cols * itemsize
    ):
        return 0
    return best


def joints_mse_loss(output, target, *, target_block_bytes=2 * 1024 * 1024):
    """JointsMSELoss forward.  output/target: (B, J, H, W), any float dtype."""
    assert output.shape == target.shape, "output/target shape mismatch"
    shape = output.shape
    n_total = math.prod(shape)
    itemsize = jnp.dtype(output.dtype).itemsize

    # ---- lane-dense 2-D view: no transpose, no wrapper dtype cast ----------
    hw = math.prod(shape[2:]) if len(shape) > 2 else 1
    if len(shape) > 2 and hw % 128 == 0:
        n_cols = hw                              # (B*J, H*W): metadata reshape
        pred2d = output.reshape(-1, n_cols)
        tgt2d = target.reshape(-1, n_cols)
    elif n_total % 128 == 0:
        n_cols = 128
        pred2d = output.reshape(-1, n_cols)
        tgt2d = target.reshape(-1, n_cols)
    else:
        # Awkward total size: zero-pad the flat tail (zeros add 0 to the sum).
        n_cols = 128
        pad = _round_up(n_total, n_cols) - n_total
        pred2d = jnp.pad(output.reshape(-1), (0, pad)).reshape(-1, n_cols)
        tgt2d = jnp.pad(target.reshape(-1), (0, pad)).reshape(-1, n_cols)
    n_rows = pred2d.shape[0]

    # ---- choose row tile: multiple of 8, VMEM-budget capped ----------------
    tile_r = _pick_tile_rows(n_rows, n_cols, itemsize, target_block_bytes)
    if tile_r == 0:
        cap = max(8, (target_block_bytes // (n_cols * itemsize)) // 8 * 8)
        tile_r = min(cap, _round_up(n_rows, 8))
        rows_padded = _round_up(n_rows, tile_r)
        rpad = rows_padded - n_rows
        if rpad:
            pred2d = jnp.pad(pred2d, ((0, rpad), (0, 0)))
            tgt2d = jnp.pad(tgt2d, ((0, rpad), (0, 0)))
        n_rows = rows_padded
    num_blocks = n_rows // tile_r
    tile_g = tile_r // 8

    # 3-D view (leading-axis split only -> free, keeps native (8,128) tiling).
    pred3d = pred2d.reshape(n_rows // 8, 8, n_cols)
    tgt3d = tgt2d.reshape(n_rows // 8, 8, n_cols)

    partials = pl.pallas_call(
        _sq_diff_partial_kernel,
        out_shape=jax.ShapeDtypeStruct((num_blocks * 8, n_cols), jnp.float32),
        grid_spec=pltpu.PrefetchScalarGridSpec(
            num_scalar_prefetch=0,
            grid=(num_blocks,),
            in_specs=[
                pl.BlockSpec((tile_g, 8, n_cols), lambda i: (i, 0, 0)),
                pl.BlockSpec((tile_g, 8, n_cols), lambda i: (i, 0, 0)),
            ],
            out_specs=pl.BlockSpec((8, n_cols), lambda i: (i, 0)),
        ),
        compiler_params=pltpu.CompilerParams(
            dimension_semantics=("parallel",),   # megacore-friendly on v7x
        ),
    )(pred3d, tgt3d)

    # Tiny final reduction; single divide by the TRUE element count
    # (zero padding contributes nothing to the sum).
    return jnp.sum(partials) / jnp.float32(n_total)


def _reference_loss(output, target):
    # Pure-JAX reference matching the PyTorch module exactly.
    B, J = output.shape[0], output.shape[1]
    p = output.reshape(B, J, -1).astype(jnp.float32)
    t = target.reshape(B, J, -1).astype(jnp.float32)
    per_joint = jnp.mean((p - t) ** 2, axis=(0, 2))  # mean over (B, H*W)
    return jnp.sum(per_joint) / J


if __name__ == "__main__":
    key = jax.random.PRNGKey(0)

    # Main check: module's natural shape (B, J, H, W) = (2, 4, 16, 16), f32.
    k1, k2, k3, k4, k5, k6 = jax.random.split(key, 6)
    out_f32 = jax.random.normal(k1, (2, 4, 16, 16), dtype=jnp.float32)
    tgt_f32 = jax.random.normal(k2, (2, 4, 16, 16), dtype=jnp.float32)
    loss = joints_mse_loss(out_f32, tgt_f32)
    jax.block_until_ready(loss)
    ref = _reference_loss(out_f32, tgt_f32)
    assert jnp.allclose(loss, ref, rtol=1e-5, atol=1e-6), (loss, ref)

    # Awkward-shape / bf16 check (exercises the zero-padding fallback path,
    # native-dtype streaming with in-kernel f32 upcast).
    out_bf = jax.random.normal(k3, (2, 3, 7, 9), dtype=jnp.bfloat16)
    tgt_bf = jax.random.normal(k4, (2, 3, 7, 9), dtype=jnp.bfloat16)
    loss_bf = joints_mse_loss(out_bf, tgt_bf)
    jax.block_until_ready(loss_bf)
    ref_bf = _reference_loss(out_bf, tgt_bf)
    assert jnp.allclose(loss_bf, ref_bf, rtol=1e-5, atol=1e-6), (loss_bf, ref_bf)

    # Multi-block check (forces several parallel grid steps + partial sums).
    out_mb = jax.random.normal(k5, (4, 8, 16, 16), dtype=jnp.float32)
    tgt_mb = jax.random.normal(k6, (4, 8, 16, 16), dtype=jnp.float32)
    loss_mb = joints_mse_loss(out_mb, tgt_mb, target_block_bytes=8 * 256 * 4)
    jax.block_until_ready(loss_mb)
    ref_mb = _reference_loss(out_mb, tgt_mb)
    assert jnp.allclose(loss_mb, ref_mb, rtol=1e-5, atol=1e-6), (loss_mb, ref_mb)

    print("KERNEL_OK")
</pallas_src>

<mosaic_0001>
module attributes {stable_mosaic.version = 11 : i64} {
  func.func @_sq_diff_partial_kernel(%arg0: i32, %arg1: memref<1x8x256xf32, #tpu.memory_space<vmem>>, %arg2: memref<1x8x256xf32, #tpu.memory_space<vmem>>, %arg3: memref<8x256xf32, #tpu.memory_space<vmem>>) attributes {dimension_semantics = [#tpu.dimension_semantics<parallel>], iteration_bounds = array<i64: 1>, scalar_prefetch = 0 : i64, scratch_operands = 0 : i64, tpu.core_type = #tpu.core_type<tc>, window_params = [{transform_indices = @transform_0, window_bounds = array<i64: 1, 8, 256>}, {transform_indices = @transform_1, window_bounds = array<i64: 1, 8, 256>}, {transform_indices = @transform_2, window_bounds = array<i64: 8, 256>}]} {
    %c0 = arith.constant 0 : index
    %c0_0 = arith.constant 0 : index
    %c0_1 = arith.constant 0 : index
    %0 = vector.load %arg1[%c0, %c0_0, %c0_1] : memref<1x8x256xf32, #tpu.memory_space<vmem>>, vector<1x8x256xf32>
    %c0_2 = arith.constant 0 : index
    %c0_3 = arith.constant 0 : index
    %c0_4 = arith.constant 0 : index
    %1 = vector.load %arg2[%c0_2, %c0_3, %c0_4] : memref<1x8x256xf32, #tpu.memory_space<vmem>>, vector<1x8x256xf32>
    %2 = arith.subf %0, %1 : vector<1x8x256xf32>
    %3 = arith.mulf %2, %2 : vector<1x8x256xf32>
    %cst = arith.constant dense<0.000000e+00> : vector<8x256xf32>
    %4 = vector.multi_reduction <add>, %3, %cst [0] : vector<1x8x256xf32> to vector<8x256xf32>
    %c0_5 = arith.constant 0 : index
    %c0_6 = arith.constant 0 : index
    %5 = vector.load %arg3[%c0_5, %c0_6] : memref<8x256xf32, #tpu.memory_space<vmem>>, vector<8x256xf32>
    tpu.vector_store %arg3[%c0_5, %c0_6], %4 {strides = array<i32>} : memref<8x256xf32, #tpu.memory_space<vmem>>, vector<8x256xf32>,
    return
  }
  func.func @transform_0(%arg0: i32) -> (i32, i32, i32) {
    %c0_i32 = arith.constant 0 : i32
    %c0_i32_0 = arith.constant 0 : i32
    %c0_i32_1 = arith.constant 0 : i32
    return %arg0, %c0_i32, %c0_i32_0 : i32, i32, i32
  }
  func.func @transform_1(%arg0: i32) -> (i32, i32, i32) {
    %c0_i32 = arith.constant 0 : i32
    %c0_i32_0 = arith.constant 0 : i32
    %c0_i32_1 = arith.constant 0 : i32
    return %arg0, %c0_i32, %c0_i32_0 : i32, i32, i32
  }
  func.func @transform_2(%arg0: i32) -> (i32, i32) {
    %c0_i32 = arith.constant 0 : i32
    %c0_i32_0 = arith.constant 0 : i32
    return %arg0, %c0_i32 : i32, i32
  }
}

</mosaic_0001>

<bundles_post_ra>
// kernel: tpu_custom_call.1
= control target key start
LH: loop header
LB: loop body
LE: loop exit
PB: predicated region body
PF: predicated region fallthrough
CT: control target
= control target key end

     0   :  { %7 = vsyncpa [#allocation3], 0  ;;  %s193_s0 = inlined_call_operand.hbm [shape: f32[1,8,256], index: 0, kind: input, shape index: {}]   ;;  %s194_s1 = inlined_call_operand.hbm [shape: f32[1,8,256], index: 1, kind: input, shape index: {}]   ;;  %s195_s2 = inlined_call_operand.hbm [shape: f32[8,256], index: 2, kind: output, shape index: {}]  }
   0x1   :  { %8 = vsyncpa [#allocation6], 0 }
   0x2   :  { %9 = vsyncpa [#allocation4], 0  ;;  %s139_s9 = smov [#allocation2]   ;;  %s140_s11 = smov [#allocation5]  }
   0x3   :  { %s16_s10 = sshll.u32 %s139_s9, 4  ;;  %s26_s12 = sshll.u32 %s140_s11, 4  ;;  %s17_s10 = int_to_ptr.vmem [resolvable:$true] %s16_s10  ;;  %s27_s12 = int_to_ptr.vmem [resolvable:$true] %s26_s12 }
   0x4   :  { %s67_s15 = scalar_lea.hbm %s193_s0, 256 }
   0x5   :  { %p68_p0 = scmp.ne.s32.totalorder %s193_s0, %s67_s15  ;;  %p71_p1 = scmp.lt.u32.totalorder %s67_s15, %s193_s0 }
   0x7   :  { %p73_p2 = pnand %p71_p1, %p68_p0 }
   0x9   :  { %76 = shalt.err (!%p73_p2)
}
   0xa   :  { %s77_s20 = scalar_lea.vmem %s17_s10, 256  ;;  %p82_p4 = scmp.lt.s32.totalorder %s17_s10, %s17_s10 }
   0xb   :  { %p78_p3 = scmp.ne.s32.totalorder %s17_s10, %s77_s20  ;;  %p83_p5 = scmp.lt.s32.totalorder %s77_s20, %s77_s20 }
   0xd   :  { %p84_p6 = por %p83_p5, %p82_p4 }
   0xf   :  { %p85_p7 = pnand %p84_p6, %p78_p3 }
  0x11   :  { %88 = shalt.err (!%p85_p7)
}
  0x12   :  { %19 = dma.hbm_to_vmem [thread:$0]  %s193_s0, 256, %s17_s10, [#allocation3]  }
  0x13   :  { %s89_s25 = scalar_lea.hbm %s194_s1, 256 }
  0x14   :  { %p90_p8 = scmp.ne.s32.totalorder %s194_s1, %s89_s25  ;;  %p93_p9 = scmp.lt.u32.totalorder %s89_s25, %s194_s1 }
  0x16   :  { %p95_p10 = pnand %p93_p9, %p90_p8 }
  0x18   :  { %98 = shalt.err (!%p95_p10)
}
  0x19   :  { %s99_s30 = scalar_lea.vmem %s27_s12, 256  ;;  %p104_p12 = scmp.lt.s32.totalorder %s27_s12, %s27_s12 }
  0x1a   :  { %p100_p11 = scmp.ne.s32.totalorder %s27_s12, %s99_s30  ;;  %p105_p13 = scmp.lt.s32.totalorder %s99_s30, %s99_s30 }
  0x1c   :  { %p106_p0 = por %p105_p13, %p104_p12 }
  0x1e   :  { %p107_p1 = pnand %p106_p0, %p100_p11 }
  0x20   :  { %110 = shalt.err (!%p107_p1)
}
  0x21   :  { %29 = dma.hbm_to_vmem [thread:$0]  %s194_s1, 256, %s27_s12, [#allocation6]  }
  0x22   :  { %133 = dma.done.wait [#allocation3], 256  }
  0x23   :  { %134 = vsyncadd [#allocation3], 4294967040 }
  0x24   :  { %135 = dma.done.wait [#allocation6], 256  }
  0x25   :  { %136 = vsyncadd [#allocation6], 4294967040  ;;  %v36_v0 = vld [vmem:[#allocation2] sm:$0xff]  ;;  %v38_v1 = vld [vmem:[#allocation5] sm:$0xff]  ;;  %s141_s4 = smov [#allocation7]  }
  0x26   :  { %v37_v2 = vld [vmem:[#allocation2 + $0x8] sm:$0xff]  ;;  %v40_v3 = vsub.f32 %v36_v0, %v38_v1  ;;  %v39_v4 = vld [vmem:[#allocation5 + $0x8] sm:$0xff]  ;;  %s54_s5 = sshll.u32 %s141_s4, 4  ;;  %s55_s5 = int_to_ptr.vmem [resolvable:$true] %s54_s5 }
  0x27   :  { %v41_v5 = vsub.f32 %v37_v2, %v39_v4  ;;  %s111_s6 = scalar_lea.vmem %s55_s5, 256  ;;  %p116_p3 = scmp.lt.s32.totalorder %s55_s5, %s55_s5 }
  0x28   :  { %v42_v6 = vmul.f32 %v40_v3, %v40_v3  ;;  %p112_p2 = scmp.ne.s32.totalorder %s55_s5, %s111_s6  ;;  %p117_p4 = scmp.lt.s32.totalorder %s111_s6, %s111_s6 }
  0x29   :  { %v43_v7 = vmul.f32 %v41_v5, %v41_v5 }
  0x2a   :  { %46 = vst [vmem:[#allocation7] sm:$0xff] %v42_v6  ;;  %p118_p5 = por %p117_p4, %p116_p3 }
  0x2b   :  { %47 = vst [vmem:[#allocation7 + $0x8] sm:$0xff] %v43_v7 }
  0x2c   :  { %p119_p6 = pnand %p118_p5, %p112_p2 }
  0x2e   :  { %122 = shalt.err (!%p119_p6)
}
  0x2f   :  { %s123_s8 = scalar_lea.hbm %s195_s2, 256 }
  0x30   :  { %p124_p7 = scmp.ne.s32.totalorder %s195_s2, %s123_s8  ;;  %p127_p8 = scmp.lt.u32.totalorder %s123_s8, %s195_s2 }
  0x32   :  { %p129_p9 = pnand %p127_p8, %p124_p7 }
  0x34   :  { %132 = shalt.err (!%p129_p9)
}
  0x35   :  { %57 = dma.vmem_to_hbm [thread:$0]  %s55_s5, 256, %s195_s2, [#allocation4]  }
  0x36   :  { %137 = dma.done.wait [#allocation4], 256  }
  0x37   :  { %138 = vsyncadd [#allocation4], 4294967040 }
  0x38   :  { %61 = vsyncpa [#allocation3], 1 }
  0x39   :  { %62 = vsyncpa [#allocation6], 1 }
  0x3a   :  { %63 = vsyncpa [#allocation4], 1 }

</bundles_post_ra>
